<compile_context>
chip_gen: v7x
topology: tpu7x:2x2x1
jax: 0.10.0
libtpu: 0.0.40
codegen_flags: <defaults>
</compile_context>

<pallas_src>
import jax
import jax.numpy as jnp
from jax.experimental import pallas as pl
from jax.experimental.pallas import tpu as pltpu


def _disc_kernel(u_ref, hpl_ref, hmi_ref, b_ref, out_ref):
    # u_ref:   (TB, n_h)      precomputed U[b] = W @ c[b]
    # hpl_ref: (TB, TN, n_h)
    # hmi_ref: (TB, TN, n_h)
    # b_ref:   (1,) in SMEM   bilinear bias
    # out_ref: (TB, 2, TN)    [:,0,:] = sc_1 tile, [:,1,:] = sc_2 tile
    bias = b_ref[0]
    u = u_ref[...].astype(jnp.float32)[:, None, :]              # (TB, 1, n_h)
    hpl = hpl_ref[...].astype(jnp.float32)                      # f32 math even for bf16 inputs
    hmi = hmi_ref[...].astype(jnp.float32)
    out_ref[:, 0, :] = jnp.sum(hpl * u, axis=-1) + bias         # (TB, TN)
    out_ref[:, 1, :] = jnp.sum(hmi * u, axis=-1) + bias         # (TB, TN)


def _vmem_budget():
    """Per-h-tile byte target + scoped-VMEM limit, sized per TPU generation."""
    try:
        phys = pltpu.get_tpu_info().vmem_capacity_bytes
    except Exception:
        phys = 64 << 20                          # conservative: v7x per-TC VMEM
    limit = min(phys * 3 // 4, 64 << 20)         # 48 MiB on v7x, 64 MiB on v5e/v6e
    target = limit // 8                          # 2 h inputs x 2 buffers ~= half the limit
    return target, limit


def _pick_tiles(B, N, n_h, itemsize, target_bytes):
    """(TB, TN) tile sizes that are (8,128)-legal and ~target_bytes per h tile."""
    # Batch tile: TB must be a multiple of 8 or equal B (sublane rule for the
    # (TB, n_h) U block and the (TB, 2, TN) output block).
    TB = 8 if B % 8 == 0 else B
    # Node tile: take all of N when a full row-tile fits the budget; otherwise
    # a multiple of 128 (keeps the h-block sublane dim and the output lane dim
    # aligned).  A non-dividing TN is fine: grid uses cdiv, edge blocks are
    # masked on store and padded reads never reach the output.
    if TB * N * n_h * itemsize <= target_bytes or N <= 128:
        TN = N
    else:
        row128 = TB * 128 * n_h * itemsize       # bytes per 128 N-rows
        TN = max(128, (target_bytes // row128) * 128)
        TN = min(TN, ((N + 127) // 128) * 128)
    # TODO(synk): add an n_h reduction grid axis if a single (TB, 128, n_h)
    # tile ever exceeds the VMEM budget (n_h > ~8K).
    return TB, TN


def discriminator_forward(c, h_pl, h_mi, w, bias, s_bias1=None, s_bias2=None):
    """Pallas version of Discriminator.forward.

    c:    (B, n_h)
    h_pl: (B, N, n_h)   (f32 or bf16)
    h_mi: (B, N, n_h)   (f32 or bf16)
    w:    (n_h, n_h)    (= torch Bilinear weight[0])
    bias: scalar
    returns logits: (B, 2N) float32
    """
    B, N, n_h = h_pl.shape

    # Hoisted bilinear-weight contraction: one batched matmul for the whole batch.
    u = jnp.dot(c.astype(jnp.float32), w.astype(jnp.float32).T,
                preferred_element_type=jnp.float32)               # (B, n_h)
    bias_arr = jnp.asarray(bias, jnp.float32).reshape(1)

    itemsize = jnp.dtype(h_pl.dtype).itemsize
    target_bytes, vmem_limit = _vmem_budget()
    TB, TN = _pick_tiles(B, N, n_h, itemsize, target_bytes)
    grid = (pl.cdiv(B, TB), pl.cdiv(N, TN))

    cost = pl.CostEstimate(
        flops=4 * B * N * n_h,
        transcendentals=0,
        bytes_accessed=(itemsize * 2 * B * N * n_h          # h_pl + h_mi
                        + 4 * grid[1] * B * n_h              # U (re-fetched per N step)
                        + 4 * 2 * B * N + 4),                # logits + bias
    )

    out3 = pl.pallas_call(
        _disc_kernel,
        out_shape=jax.ShapeDtypeStruct((B, 2, N), jnp.float32),
        grid_spec=pltpu.PrefetchScalarGridSpec(
            num_scalar_prefetch=0,
            grid=grid,
            in_specs=[
                # U is tiny; its index_map stays independent of the N axis.
                pl.BlockSpec((TB, n_h), lambda b, n: (b, 0)),
                pl.BlockSpec((TB, TN, n_h), lambda b, n: (b, n, 0)),    # h_pl
                pl.BlockSpec((TB, TN, n_h), lambda b, n: (b, n, 0)),    # h_mi
                pl.BlockSpec(memory_space=pltpu.MemorySpace.SMEM),      # bias scalar
            ],
            out_specs=pl.BlockSpec((TB, 2, TN), lambda b, n: (b, 0, n)),
        ),
        compiler_params=pltpu.CompilerParams(
            dimension_semantics=("parallel", "parallel"),
            vmem_limit_bytes=vmem_limit),
        cost_estimate=cost,
    )(u, h_pl, h_mi, bias_arr)

    # Optional additive biases (cheap elementwise glue, kept in plain JAX).
    if s_bias1 is not None:
        out3 = out3.at[:, 0, :].add(jnp.asarray(s_bias1, out3.dtype))
    if s_bias2 is not None:
        out3 = out3.at[:, 1, :].add(jnp.asarray(s_bias2, out3.dtype))

    # (B, 2, N) -> (B, 2N) is a layout no-op matching torch.cat((sc_1, sc_2), 1).
    return out3.reshape(B, 2 * N)


def _reference(c, h_pl, h_mi, w, bias):
    # Pure-JAX reference of the bilinear discriminator.
    u = jnp.einsum("ij,bj->bi", w, c)                 # (B, n_h) = W @ c
    sc1 = jnp.einsum("bni,bi->bn", h_pl, u) + bias    # (B, N)
    sc2 = jnp.einsum("bni,bi->bn", h_mi, u) + bias    # (B, N)
    return jnp.concatenate([sc1, sc2], axis=1)


if __name__ == "__main__":
    B, N, n_h = 2, 8, 32

    key = jax.random.PRNGKey(0)
    k_c, k_pl, k_mi, k_w = jax.random.split(key, 4)

    c = jax.random.normal(k_c, (B, n_h), jnp.float32)
    h_pl = jax.random.normal(k_pl, (B, N, n_h), jnp.float32)
    h_mi = jax.random.normal(k_mi, (B, N, n_h), jnp.float32)

    # Deterministic xavier_uniform init for the Bilinear weight (1, n_h, n_h).
    fan_in = n_h * n_h
    fan_out = 1 * n_h
    bound = (6.0 / (fan_in + fan_out)) ** 0.5
    w = jax.random.uniform(k_w, (n_h, n_h), jnp.float32, -bound, bound)
    bias = jnp.float32(0.0)   # bias.data.fill_(0.0)

    logits = discriminator_forward(c, h_pl, h_mi, w, bias)
    jax.block_until_ready(logits)

    ref = _reference(c, h_pl, h_mi, w, bias)
    assert logits.shape == (B, 2 * N)
    assert jnp.allclose(logits, ref, atol=1e-4, rtol=1e-4)

    print("KERNEL_OK")
</pallas_src>

<mosaic_0001>
module attributes {stable_mosaic.version = 11 : i64} {
  func.func @_disc_kernel(%arg0: i32, %arg1: i32, %arg2: memref<2x32xf32, #tpu.memory_space<vmem>>, %arg3: memref<2x8x32xf32, #tpu.memory_space<vmem>>, %arg4: memref<2x8x32xf32, #tpu.memory_space<vmem>>, %arg5: memref<1xf32, #tpu.memory_space<smem>>, %arg6: memref<2x2x8xf32, #tpu.memory_space<vmem>>) attributes {dimension_semantics = [#tpu.dimension_semantics<parallel>, #tpu.dimension_semantics<parallel>], iteration_bounds = array<i64: 1, 1>, scalar_prefetch = 0 : i64, scratch_operands = 0 : i64, tpu.core_type = #tpu.core_type<tc>, window_params = [{transform_indices = @transform_0, window_bounds = array<i64: 2, 32>}, {transform_indices = @transform_1, window_bounds = array<i64: 2, 8, 32>}, {transform_indices = @transform_2, window_bounds = array<i64: 2, 8, 32>}, {transform_indices = @transform_3, window_bounds = array<i64: 1>}, {transform_indices = @transform_4, window_bounds = array<i64: 2, 2, 8>}]} {
    %c0 = arith.constant 0 : index
    %0 = memref.load %arg5[%c0] : memref<1xf32, #tpu.memory_space<smem>>
    %c0_0 = arith.constant 0 : index
    %c0_1 = arith.constant 0 : index
    %1 = vector.load %arg2[%c0_0, %c0_1] : memref<2x32xf32, #tpu.memory_space<vmem>>, vector<2x32xf32>
    %2 = vector.shape_cast %1 : vector<2x32xf32> to vector<2x1x32xf32>
    %c0_2 = arith.constant 0 : index
    %c0_3 = arith.constant 0 : index
    %c0_4 = arith.constant 0 : index
    %3 = vector.load %arg3[%c0_2, %c0_3, %c0_4] : memref<2x8x32xf32, #tpu.memory_space<vmem>>, vector<2x8x32xf32>
    %c0_5 = arith.constant 0 : index
    %c0_6 = arith.constant 0 : index
    %c0_7 = arith.constant 0 : index
    %4 = vector.load %arg4[%c0_5, %c0_6, %c0_7] : memref<2x8x32xf32, #tpu.memory_space<vmem>>, vector<2x8x32xf32>
    %5 = vector.broadcast %2 : vector<2x1x32xf32> to vector<2x8x32xf32>
    %6 = arith.mulf %3, %5 : vector<2x8x32xf32>
    %cst = arith.constant dense<0.000000e+00> : vector<2x8xf32>
    %7 = vector.multi_reduction <add>, %6, %cst [2] : vector<2x8x32xf32> to vector<2x8xf32>
    %8 = vector.broadcast %0 : f32 to vector<2x8xf32>
    %9 = arith.addf %7, %8 : vector<2x8xf32>
    %c0_8 = arith.constant 0 : index
    %c0_9 = arith.constant 0 : index
    %c0_10 = arith.constant 0 : index
    %10 = vector.load %arg6[%c0_8, %c0_9, %c0_10] : memref<2x2x8xf32, #tpu.memory_space<vmem>>, vector<2x1x8xf32>
    %11 = vector.shape_cast %10 : vector<2x1x8xf32> to vector<2x8xf32>
    %12 = vector.shape_cast %9 : vector<2x8xf32> to vector<2x1x8xf32>
    tpu.vector_store %arg6[%c0_8, %c0_9, %c0_10], %12 {strides = array<i32>} : memref<2x2x8xf32, #tpu.memory_space<vmem>>, vector<2x1x8xf32>,
    %13 = vector.broadcast %2 : vector<2x1x32xf32> to vector<2x8x32xf32>
    %14 = arith.mulf %4, %13 : vector<2x8x32xf32>
    %cst_11 = arith.constant dense<0.000000e+00> : vector<2x8xf32>
    %15 = vector.multi_reduction <add>, %14, %cst_11 [2] : vector<2x8x32xf32> to vector<2x8xf32>
    %16 = vector.broadcast %0 : f32 to vector<2x8xf32>
    %17 = arith.addf %15, %16 : vector<2x8xf32>
    %c0_12 = arith.constant 0 : index
    %c1 = arith.constant 1 : index
    %c0_13 = arith.constant 0 : index
    %18 = vector.load %arg6[%c0_12, %c1, %c0_13] : memref<2x2x8xf32, #tpu.memory_space<vmem>>, vector<2x1x8xf32>
    %19 = vector.shape_cast %18 : vector<2x1x8xf32> to vector<2x8xf32>
    %20 = vector.shape_cast %17 : vector<2x8xf32> to vector<2x1x8xf32>
    tpu.vector_store %arg6[%c0_12, %c1, %c0_13], %20 {strides = array<i32>} : memref<2x2x8xf32, #tpu.memory_space<vmem>>, vector<2x1x8xf32>,
    return
  }
  func.func @transform_0(%arg0: i32, %arg1: i32) -> (i32, i32) {
    %c0_i32 = arith.constant 0 : i32
    %c0_i32_0 = arith.constant 0 : i32
    return %arg0, %c0_i32 : i32, i32
  }
  func.func @transform_1(%arg0: i32, %arg1: i32) -> (i32, i32, i32) {
    %c0_i32 = arith.constant 0 : i32
    %c0_i32_0 = arith.constant 0 : i32
    return %arg0, %arg1, %c0_i32 : i32, i32, i32
  }
  func.func @transform_2(%arg0: i32, %arg1: i32) -> (i32, i32, i32) {
    %c0_i32 = arith.constant 0 : i32
    %c0_i32_0 = arith.constant 0 : i32
    return %arg0, %arg1, %c0_i32 : i32, i32, i32
  }
  func.func @transform_3(%arg0: i32, %arg1: i32) -> i32 {
    %c0_i32 = arith.constant 0 : i32
    %c0_i32_0 = arith.constant 0 : i32
    return %c0_i32 : i32
  }
  func.func @transform_4(%arg0: i32, %arg1: i32) -> (i32, i32, i32) {
    %c0_i32 = arith.constant 0 : i32
    %c0_i32_0 = arith.constant 0 : i32
    return %arg0, %c0_i32, %arg1 : i32, i32, i32
  }
}

</mosaic_0001>

<bundles_post_ra>
// kernel: tpu_custom_call.1
= control target key start
LH: loop header
LB: loop body
LE: loop exit
PB: predicated region body
PF: predicated region fallthrough
CT: control target
= control target key end

     0   :  { %10 = vsyncpa [#allocation4], 0  ;;  %s313_s0 = inlined_call_operand.vmem [shape: f32[2,32], index: 0, kind: input, shape index: {}]   ;;  %s314_s1 = inlined_call_operand.hbm [shape: f32[2,8,32], index: 1, kind: input, shape index: {}]   ;;  %s315_s2 = inlined_call_operand.hbm [shape: f32[2,8,32], index: 2, kind: input, shape index: {}]   ;;  %s316_s3 = inlined_call_operand.<no memory space> [shape: f32[1], index: 3, kind: input, shape index: {}]   ;;  %s317_s4 = inlined_call_operand.hbm [shape: f32[2,2,8], index: 4, kind: output, shape index: {}]  }
   0x1   :  { %11 = vsyncpa [#allocation7], 0 }
   0x2   :  { %12 = vsyncpa [#allocation5], 0  ;;  %s238_s15 = smov [#allocation3]   ;;  %s166_s19 = scalar_lea.hbm %s314_s1, 256 }
   0x3   :  { %s20_s16 = sshll.u32 %s238_s15, 4  ;;  %p167_p0 = scmp.ne.s32.totalorder %s314_s1, %s166_s19  ;;  %s21_s16 = int_to_ptr.vmem [resolvable:$true] %s20_s16 }
   0x4   :  { %p170_p1 = scmp.lt.u32.totalorder %s166_s19, %s314_s1 }
   0x6   :  { %p172_p2 = pnand %p170_p1, %p167_p0 }
   0x8   :  { %175 = shalt.err (!%p172_p2)
}
   0x9   :  { %s176_s24 = scalar_lea.vmem %s21_s16, 256  ;;  %p181_p4 = scmp.lt.s32.totalorder %s21_s16, %s21_s16 }
   0xa   :  { %p177_p3 = scmp.ne.s32.totalorder %s21_s16, %s176_s24  ;;  %p182_p5 = scmp.lt.s32.totalorder %s176_s24, %s176_s24 }
   0xc   :  { %p183_p6 = por %p182_p5, %p181_p4 }
   0xe   :  { %p184_p7 = pnand %p183_p6, %p177_p3 }
  0x10   :  { %187 = shalt.err (!%p184_p7)
}
  0x11   :  { %s239_s25 = smov 128   ;;  %s240_s26 = smov 8  }
  0x12   :  { %26 = dma.hbm_to_vmem [thread:$0]  %s314_s1, 256, %s21_s16, [#allocation4], %s239_s25, %s239_s25, %s240_s26  }
  0x13   :  { %s241_s29 = smov [#allocation6]   ;;  %s188_s7 = scalar_lea.hbm %s315_s2, 256 }
  0x14   :  { %s32_s30 = sshll.u32 %s241_s29, 4  ;;  %p189_p8 = scmp.ne.s32.totalorder %s315_s2, %s188_s7  ;;  %s33_s30 = int_to_ptr.vmem [resolvable:$true] %s32_s30 }
  0x15   :  { %p192_p9 = scmp.lt.u32.totalorder %s188_s7, %s315_s2 }
  0x17   :  { %p194_p10 = pnand %p192_p9, %p189_p8 }
  0x19   :  { %197 = shalt.err (!%p194_p10)
}
  0x1a   :  { %s198_s12 = scalar_lea.vmem %s33_s30, 256  ;;  %p203_p12 = scmp.lt.s32.totalorder %s33_s30, %s33_s30 }
  0x1b   :  { %p199_p11 = scmp.ne.s32.totalorder %s33_s30, %s198_s12  ;;  %p204_p13 = scmp.lt.s32.totalorder %s198_s12, %s198_s12 }
  0x1d   :  { %p205_p0 = por %p204_p13, %p203_p12 }
  0x1f   :  { %p206_p1 = pnand %p205_p0, %p199_p11 }
  0x21   :  { %209 = shalt.err (!%p206_p1)
}
  0x22   :  { %38 = dma.hbm_to_vmem [thread:$0]  %s315_s2, 256, %s33_s30, [#allocation7], %s239_s25, %s239_s25, %s240_s26  }
  0x23   :  { %232 = dma.done.wait [#allocation4], 256  }
  0x24   :  { %233 = vsyncadd [#allocation4], 4294967040 }
  0x25   :  { %234 = dma.done.wait [#allocation7], 256  }
  0x26   :  { %235 = vsyncadd [#allocation7], 4294967040  ;;  %v61_v0 = vlaneseq  ;;  %v242_v1 = vmov 1966171168   ;;  %v74_v12 = vld [vmem:[#allocation6] sm:$0xff]  ;;  %v72_v13 = vld [vmem:[#allocation3] sm:$0xff]  ;;  %v95_v27 = vstv %s316_s3 }
  0x27   :  { %v59_v2 = vunpack.c.l.s4 %v242_v1  ;;  %v157_v9 = vld.sshfl [vmem:[%s313_s0] sm:$0x11 pattern:$0x75316420]  ;;  %vm88_vm0 = vcmask 261120   ;;  %v75_v16 = vld [vmem:[#allocation6 + $0x8] sm:$0xff] }
  0x28   :  { %v62_v3 = vshrl.u32 %v61_v0, 7  ;;  %v101_v4 = vand.u32 127, %v61_v0  ;;  %v57_v11 = vcombine.high %v157_v9, %v157_v9  ;;  %v73_v17 = vld [vmem:[#allocation3 + $0x8] sm:$0xff]  ;;  %vm112_vm1 = vcmask 57344   ;;  %s243_s16 = smov [#allocation8]  }
  0x29   :  { %v60_v5 = vunpack.c.0.s8 %v59_v2  ;;  %s144_s17 = sshll.u32 %s243_s16, 4  ;;  %s145_s17 = int_to_ptr.vmem [resolvable:$true] %s144_s17 }
  0x2a   :  { %v104_v6 = vsub.s32 %v101_v4, %v62_v3  ;;  %v78_v8 = vsub.s32 0, %v62_v3  ;;  %s210_s3 = scalar_lea.vmem %s145_s17, 64  ;;  %p215_p3 = scmp.lt.s32.totalorder %s145_s17, %s145_s17 }
  0x2b   :  { %v63_v7 = vsub.s32 %v60_v5, %v62_v3  ;;  %p211_p2 = scmp.ne.s32.totalorder %s145_s17, %s210_s3  ;;  %p216_p4 = scmp.lt.s32.totalorder %s210_s3, %s210_s3 }
  0x2d   :  { %v64_v10 = vrot.slane %v157_v9, %v63_v7  ;;  %v71_v15 = vrot.slane %v57_v11, %v63_v7  ;;  %p217_p5 = por %p216_p4, %p215_p3 }
  0x2f   :  { %v79_v14 = vrot.slane %v64_v10, %v78_v8  ;;  %v83_v20 = vrot.slane %v71_v15, %v78_v8  ;;  %p218_p6 = pnand %p217_p5, %p211_p2 }
  0x31   :  { %v115_v18 = vmul.f32 %v79_v14, %v74_v12  ;;  %v86_v19 = vmul.f32 %v79_v14, %v72_v13  ;;  %v116_v23 = vmul.f32 %v83_v20, %v75_v16  ;;  %v87_v24 = vmul.f32 %v83_v20, %v73_v17 }
  0x33   :  { %v117_v21 = vsel %vm88_vm0, %v115_v18, 0.0  ;;  %v89_v22 = vsel %vm88_vm0, %v86_v19, 0.0  ;;  %v120_v25 = vsel %vm88_vm0, %v116_v23, 0.0  ;;  %v92_v26 = vsel %vm88_vm0, %v87_v24, 0.0 }
  0x34   :  { %118 = vadd.xlane.f32.xlu1 %v117_v21  ;;  %90 = vadd.xlane.f32.xlu0 %v89_v22 }
  0x38   :  { %121 = vadd.xlane.f32.xlu1 %v120_v25  ;;  %93 = vadd.xlane.f32.xlu0 %v92_v26 }
  0xc1   :  { %v119_v28 = vpop.xlane.xlu1 %118  ;;  %v91_v29 = vpop.xlane.xlu0 %90 }
  0xc2   :  { %v123_v30 = vadd.f32 %v119_v28, %v95_v27  ;;  %v96_v31 = vadd.f32 %v95_v27, %v91_v29 }
  0xc4   :  { %v130_v32 = vrot.slane %v123_v30, %v104_v6  ;;  %v105_v33 = vrot.slane %v96_v31, %v104_v6 }
  0xc5   :  { %v122_v34 = vpop.xlane.xlu1 %121  ;;  %v94_v35 = vpop.xlane.xlu0 %93 }
  0xc6   :  { %137 = vst.msk [vmem:[#allocation8 + $0x1] sm:$0x1] %vm112_vm1, %v130_v32  ;;  %113 = vst.msk [vmem:[#allocation8] sm:$0x1] %vm112_vm1, %v105_v33  ;;  %v124_v36 = vadd.f32 %v122_v34, %v95_v27  ;;  %v97_v37 = vadd.f32 %v95_v27, %v94_v35 }
  0xc8   :  { %v134_v38 = vrot.slane %v124_v36, %v104_v6  ;;  %v109_v39 = vrot.slane %v97_v37, %v104_v6 }
  0xca   :  { %138 = vst.msk [vmem:[#allocation8 + $0x3] sm:$0x1] %vm112_vm1, %v134_v38  ;;  %114 = vst.msk [vmem:[#allocation8 + $0x2] sm:$0x1] %vm112_vm1, %v109_v39 }
  0xcb   :  { %221 = shalt.err (!%p218_p6)
}
  0xcc   :  { %s222_s20 = scalar_lea.hbm %s317_s4, 64 }
  0xcd   :  { %p223_p7 = scmp.ne.s32.totalorder %s317_s4, %s222_s20  ;;  %p226_p8 = scmp.lt.u32.totalorder %s222_s20, %s317_s4 }
  0xcf   :  { %p228_p9 = pnand %p226_p8, %p223_p7 }
  0xd1   :  { %231 = shalt.err (!%p228_p9)
}
  0xd2   :  { %s244_s25 = smov 32   ;;  %s245_s26 = smov 2  }
  0xd3   :  { %150 = dma.vmem_to_hbm [thread:$0]  %s145_s17, 64, %s317_s4, [#allocation5], %s244_s25, %s244_s25, %s245_s26  }
  0xd4   :  { %236 = dma.done.wait [#allocation5], 64  }
  0xd5   :  { %237 = vsyncadd [#allocation5], 4294967232 }
  0xd6   :  { %154 = vsyncpa [#allocation4], 1 }
  0xd7   :  { %155 = vsyncpa [#allocation7], 1 }
  0xd8   :  { %156 = vsyncpa [#allocation5], 1 }

</bundles_post_ra>
